<compile_context>
chip_gen: v7x
topology: tpu7x:2x2x1
jax: 0.10.0
libtpu: 0.0.40
codegen_flags: <defaults>
</compile_context>

<pallas_src>
import functools

import jax
import jax.numpy as jnp
from jax.experimental import pallas as pl
from jax.experimental.pallas import tpu as pltpu


def dqn_kernel(x_ref, w1_ref, b1_ref, w2_ref, b2_ref, w3_ref, b3_ref, o_ref):
    # ---- fc1 + ReLU on the VPU (K = state_size is tiny: degenerate for MXU).
    x = x_ref[...]                       # (TM, S)  f32
    w1 = w1_ref[...]                     # (S, H)   f32
    h1 = b1_ref[...]                     # (1, H) -> broadcasts up to (TM, H)
    for k in range(x_ref.shape[1]):      # static, S iterations (S = 4)
        h1 = h1 + x[:, k:k + 1] * w1[k:k + 1, :]
    h1 = jnp.maximum(h1, 0.0)

    # ---- fc2 + ReLU on the MXU (bf16 operands, f32 accumulation).
    h2 = jnp.dot(h1.astype(jnp.bfloat16), w2_ref[...],
                 preferred_element_type=jnp.float32)
    h2 = jnp.maximum(h2 + b2_ref[...], 0.0)

    # ---- fc3 (no activation).  Output width is pre-padded to a multiple of
    # 128 lanes, so this store is lane-dense (unmasked vst).
    o = jnp.dot(h2.astype(jnp.bfloat16), w3_ref[...],
                preferred_element_type=jnp.float32)
    o_ref[...] = (o + b3_ref[...]).astype(o_ref.dtype)


def _batch_tile(batch):
    """Largest useful batch tile.

    Step-overhead-bound kernel -> big tiles, but capped at ceil(B/2) so that
    B >= 16 always yields >= 2 grid steps (lets v7x's two TensorCores split the
    'parallel' batch axis).  Tiles other than the full batch must be multiples
    of 8 sublanes (BlockSpec divisibility rule)."""
    if batch <= 8:
        return batch                  # single step; too small to split
    half = -(-batch // 2)             # ceil(B / 2): guarantees >= 2 grid steps
    half = -(-half // 8) * 8          # round up to a multiple of 8 sublanes
    return min(512, half)


@functools.partial(jax.jit, static_argnames=("action_size", "n_quantiles"))
def dqn_forward(state, params, action_size, n_quantiles):
    """state: (B, state_size) f32 -> (B, action_size, n_quantiles) f32."""
    w1, b1, w2, b2, w3, b3 = params
    B, S = state.shape
    H = w1.shape[1]
    out_dim = action_size * n_quantiles
    out_pad = w3.shape[1]             # already zero-padded to a 128 multiple

    TM = _batch_tile(B)
    grid = (pl.cdiv(B, TM),)

    def resident(shape):
        # Same block index every grid step -> stays in VMEM (DMA'd once);
        # a single buffer is enough, skip the default double-buffer.
        return pl.BlockSpec(shape, lambda i: (0, 0),
                            pipeline_mode=pl.Buffered(1))

    out = pl.pallas_call(
        dqn_kernel,
        out_shape=jax.ShapeDtypeStruct((B, out_pad), jnp.float32),
        grid=grid,
        in_specs=[
            pl.BlockSpec((TM, S), lambda i: (i, 0)),          # x: batch-tiled
            resident((S, H)), resident((1, H)),               # fc1 (f32, VPU)
            resident((H, H)), resident((1, H)),               # fc2 (bf16 W)
            resident((H, out_pad)), resident((1, out_pad)),   # fc3 (bf16 W, padded)
        ],
        out_specs=pl.BlockSpec((TM, out_pad), lambda i: (i, 0)),
        compiler_params=pltpu.CompilerParams(
            dimension_semantics=("parallel",)),               # megacore on v7x
    )(state, w1, b1, w2, b2, w3, b3)
    return out[:, :out_dim].reshape(B, action_size, n_quantiles)


def init_linear_params(key, in_features, out_features):
    """PyTorch nn.Linear init: U(-1/sqrt(fan_in), 1/sqrt(fan_in)).
    Weight returned as (in_features, out_features) so the kernel computes x @ W."""
    kw, kb = jax.random.split(key)
    bound = 1.0 / jnp.sqrt(jnp.float32(in_features))
    w = jax.random.uniform(kw, (in_features, out_features), jnp.float32, -bound, bound)
    b = jax.random.uniform(kb, (1, out_features), jnp.float32, -bound, bound)
    return w, b


def prepare_params(fc1, fc2, fc3, action_size, n_quantiles):
    """Pack params into the kernel layout (done once, outside jit):
       fc1 stays f32 (VPU path), fc2/fc3 weights -> bf16 (MXU operands, halved
       HBM->VMEM DMA), fc3 zero-padded out to a multiple of 128 lanes."""
    (w1, b1), (w2, b2), (w3, b3) = fc1, fc2, fc3
    out_dim = action_size * n_quantiles
    assert w3.shape[1] == out_dim
    out_pad = max(128, -(-out_dim // 128) * 128)
    H = w3.shape[0]
    w3p = jnp.zeros((H, out_pad), jnp.float32).at[:, :out_dim].set(w3)
    b3p = jnp.zeros((1, out_pad), jnp.float32).at[:, :out_dim].set(b3)
    return (w1, b1,
            w2.astype(jnp.bfloat16), b2,
            w3p.astype(jnp.bfloat16), b3p)


def ref_forward(state, params, action_size, n_quantiles):
    """Pure-JAX reference replicating the kernel's exact precision path."""
    w1, b1, w2, b2, w3, b3 = params
    h1 = jnp.maximum(
        jnp.dot(state, w1, preferred_element_type=jnp.float32) + b1, 0.0)
    h2 = jnp.maximum(
        jnp.dot(h1.astype(jnp.bfloat16), w2, preferred_element_type=jnp.float32) + b2,
        0.0)
    o = jnp.dot(h2.astype(jnp.bfloat16), w3, preferred_element_type=jnp.float32) + b3
    out_dim = action_size * n_quantiles
    return o[:, :out_dim].reshape(state.shape[0], action_size, n_quantiles)


if __name__ == "__main__":
    # CartPole-like sizes: state_size=4, action_size=2, n_quantiles=32, batch=8.
    state_size, action_size, n_quantiles, hidden = 4, 2, 32, 256
    batch = 8

    key = jax.random.PRNGKey(0)
    k_in, k1, k2, k3 = jax.random.split(key, 4)

    fc1 = init_linear_params(k1, state_size, hidden)
    fc2 = init_linear_params(k2, hidden, hidden)
    fc3 = init_linear_params(k3, hidden, action_size * n_quantiles)
    params = prepare_params(fc1, fc2, fc3, action_size, n_quantiles)

    state = jax.random.normal(k_in, (batch, state_size), jnp.float32)
    out = jax.block_until_ready(
        dqn_forward(state, params, action_size, n_quantiles))
    ref = ref_forward(state, params, action_size, n_quantiles)
    assert out.shape == (batch, action_size, n_quantiles)
    assert jnp.allclose(out, ref, atol=1e-2, rtol=1e-2), (
        float(jnp.max(jnp.abs(out - ref))))

    # Also exercise the multi-step grid (>= 2 tiles for v7x megacore) and the
    # masked-store path on a ragged last batch tile.
    big_state = jax.random.normal(k_in, (200, state_size), jnp.float32)
    out_big = jax.block_until_ready(
        dqn_forward(big_state, params, action_size, n_quantiles))
    ref_big = ref_forward(big_state, params, action_size, n_quantiles)
    assert jnp.allclose(out_big, ref_big, atol=1e-2, rtol=1e-2), (
        float(jnp.max(jnp.abs(out_big - ref_big))))

    print("KERNEL_OK")
</pallas_src>

<mosaic_0001>
module attributes {stable_mosaic.version = 11 : i64} {
  func.func @dqn_kernel(%arg0: i32, %arg1: memref<8x4xf32, #tpu.memory_space<vmem>>, %arg2: memref<4x256xf32, #tpu.memory_space<vmem>>, %arg3: memref<1x256xf32, #tpu.memory_space<vmem>>, %arg4: memref<256x256xbf16, #tpu.memory_space<vmem>>, %arg5: memref<1x256xf32, #tpu.memory_space<vmem>>, %arg6: memref<256x128xbf16, #tpu.memory_space<vmem>>, %arg7: memref<1x128xf32, #tpu.memory_space<vmem>>, %arg8: memref<8x128xf32, #tpu.memory_space<vmem>>) attributes {dimension_semantics = [#tpu.dimension_semantics<parallel>], iteration_bounds = array<i64: 1>, scalar_prefetch = 0 : i64, scratch_operands = 0 : i64, tpu.core_type = #tpu.core_type<tc>, window_params = [{transform_indices = @transform_0, window_bounds = array<i64: 8, 4>}, {pipeline_mode = #tpu.pipeline_mode<synchronous>, transform_indices = @transform_1, window_bounds = array<i64: 4, 256>}, {pipeline_mode = #tpu.pipeline_mode<synchronous>, transform_indices = @transform_2, window_bounds = array<i64: 1, 256>}, {pipeline_mode = #tpu.pipeline_mode<synchronous>, transform_indices = @transform_3, window_bounds = array<i64: 256, 256>}, {pipeline_mode = #tpu.pipeline_mode<synchronous>, transform_indices = @transform_4, window_bounds = array<i64: 1, 256>}, {pipeline_mode = #tpu.pipeline_mode<synchronous>, transform_indices = @transform_5, window_bounds = array<i64: 256, 128>}, {pipeline_mode = #tpu.pipeline_mode<synchronous>, transform_indices = @transform_6, window_bounds = array<i64: 1, 128>}, {transform_indices = @transform_7, window_bounds = array<i64: 8, 128>}]} {
    %c0 = arith.constant 0 : index
    %c0_0 = arith.constant 0 : index
    %0 = vector.load %arg1[%c0, %c0_0] : memref<8x4xf32, #tpu.memory_space<vmem>>, vector<8x4xf32>
    %c0_1 = arith.constant 0 : index
    %c0_2 = arith.constant 0 : index
    %1 = vector.load %arg2[%c0_1, %c0_2] : memref<4x256xf32, #tpu.memory_space<vmem>>, vector<4x256xf32>
    %c0_3 = arith.constant 0 : index
    %c0_4 = arith.constant 0 : index
    %2 = vector.load %arg3[%c0_3, %c0_4] : memref<1x256xf32, #tpu.memory_space<vmem>>, vector<1x256xf32>
    %3 = vector.extract_strided_slice %0 {offsets = [0, 0], sizes = [8, 1], strides = [1, 1]} : vector<8x4xf32> to vector<8x1xf32>
    %4 = vector.extract_strided_slice %1 {offsets = [0, 0], sizes = [1, 256], strides = [1, 1]} : vector<4x256xf32> to vector<1x256xf32>
    %5 = vector.broadcast %3 : vector<8x1xf32> to vector<8x256xf32>
    %6 = vector.broadcast %4 : vector<1x256xf32> to vector<8x256xf32>
    %7 = arith.mulf %5, %6 : vector<8x256xf32>
    %8 = vector.broadcast %2 : vector<1x256xf32> to vector<8x256xf32>
    %9 = arith.addf %8, %7 : vector<8x256xf32>
    %10 = vector.extract_strided_slice %0 {offsets = [0, 1], sizes = [8, 1], strides = [1, 1]} : vector<8x4xf32> to vector<8x1xf32>
    %11 = vector.extract_strided_slice %1 {offsets = [1, 0], sizes = [1, 256], strides = [1, 1]} : vector<4x256xf32> to vector<1x256xf32>
    %12 = vector.broadcast %10 : vector<8x1xf32> to vector<8x256xf32>
    %13 = vector.broadcast %11 : vector<1x256xf32> to vector<8x256xf32>
    %14 = arith.mulf %12, %13 : vector<8x256xf32>
    %15 = arith.addf %9, %14 : vector<8x256xf32>
    %16 = vector.extract_strided_slice %0 {offsets = [0, 2], sizes = [8, 1], strides = [1, 1]} : vector<8x4xf32> to vector<8x1xf32>
    %17 = vector.extract_strided_slice %1 {offsets = [2, 0], sizes = [1, 256], strides = [1, 1]} : vector<4x256xf32> to vector<1x256xf32>
    %18 = vector.broadcast %16 : vector<8x1xf32> to vector<8x256xf32>
    %19 = vector.broadcast %17 : vector<1x256xf32> to vector<8x256xf32>
    %20 = arith.mulf %18, %19 : vector<8x256xf32>
    %21 = arith.addf %15, %20 : vector<8x256xf32>
    %22 = vector.extract_strided_slice %0 {offsets = [0, 3], sizes = [8, 1], strides = [1, 1]} : vector<8x4xf32> to vector<8x1xf32>
    %23 = vector.extract_strided_slice %1 {offsets = [3, 0], sizes = [1, 256], strides = [1, 1]} : vector<4x256xf32> to vector<1x256xf32>
    %24 = vector.broadcast %22 : vector<8x1xf32> to vector<8x256xf32>
    %25 = vector.broadcast %23 : vector<1x256xf32> to vector<8x256xf32>
    %26 = arith.mulf %24, %25 : vector<8x256xf32>
    %27 = arith.addf %21, %26 : vector<8x256xf32>
    %cst = arith.constant 0.000000e+00 : f32
    %28 = vector.broadcast %cst : f32 to vector<8x256xf32>
    %29 = arith.maximumf %27, %28 : vector<8x256xf32>
    %30 = arith.truncf %29 : vector<8x256xf32> to vector<8x256xbf16>
    %c0_5 = arith.constant 0 : index
    %c0_6 = arith.constant 0 : index
    %31 = vector.load %arg4[%c0_5, %c0_6] : memref<256x256xbf16, #tpu.memory_space<vmem>>, vector<256x256xbf16>
    %cst_7 = arith.constant dense<0.000000e+00> : vector<8x256xf32>
    %32 = tpu.matmul %30, %31, %cst_7 {dimension_numbers = #tpu.dot_dimension_numbers<[1], [0], [0], [1], [0, 0, 1, 1], [], []>} : vector<8x256xbf16>, vector<256x256xbf16>, vector<8x256xf32> -> vector<8x256xf32>
    %c0_8 = arith.constant 0 : index
    %c0_9 = arith.constant 0 : index
    %33 = vector.load %arg5[%c0_8, %c0_9] : memref<1x256xf32, #tpu.memory_space<vmem>>, vector<1x256xf32>
    %34 = vector.broadcast %33 : vector<1x256xf32> to vector<8x256xf32>
    %35 = arith.addf %32, %34 : vector<8x256xf32>
    %cst_10 = arith.constant 0.000000e+00 : f32
    %36 = vector.broadcast %cst_10 : f32 to vector<8x256xf32>
    %37 = arith.maximumf %35, %36 : vector<8x256xf32>
    %38 = arith.truncf %37 : vector<8x256xf32> to vector<8x256xbf16>
    %c0_11 = arith.constant 0 : index
    %c0_12 = arith.constant 0 : index
    %39 = vector.load %arg6[%c0_11, %c0_12] : memref<256x128xbf16, #tpu.memory_space<vmem>>, vector<256x128xbf16>
    %cst_13 = arith.constant dense<0.000000e+00> : vector<8x128xf32>
    %40 = tpu.matmul %38, %39, %cst_13 {dimension_numbers = #tpu.dot_dimension_numbers<[1], [0], [0], [1], [0, 0, 1, 1], [], []>} : vector<8x256xbf16>, vector<256x128xbf16>, vector<8x128xf32> -> vector<8x128xf32>
    %c0_14 = arith.constant 0 : index
    %c0_15 = arith.constant 0 : index
    %41 = vector.load %arg7[%c0_14, %c0_15] : memref<1x128xf32, #tpu.memory_space<vmem>>, vector<1x128xf32>
    %42 = vector.broadcast %41 : vector<1x128xf32> to vector<8x128xf32>
    %43 = arith.addf %40, %42 : vector<8x128xf32>
    %c0_16 = arith.constant 0 : index
    %c0_17 = arith.constant 0 : index
    %44 = vector.load %arg8[%c0_16, %c0_17] : memref<8x128xf32, #tpu.memory_space<vmem>>, vector<8x128xf32>
    tpu.vector_store %arg8[%c0_16, %c0_17], %43 {strides = array<i32>} : memref<8x128xf32, #tpu.memory_space<vmem>>, vector<8x128xf32>,
    return
  }
  func.func @transform_0(%arg0: i32) -> (i32, i32) {
    %c0_i32 = arith.constant 0 : i32
    %c0_i32_0 = arith.constant 0 : i32
    return %arg0, %c0_i32 : i32, i32
  }
  func.func @transform_1(%arg0: i32) -> (i32, i32) {
    %c0_i32 = arith.constant 0 : i32
    %c0_i32_0 = arith.constant 0 : i32
    %c0_i32_1 = arith.constant 0 : i32
    return %c0_i32, %c0_i32_0 : i32, i32
  }
  func.func @transform_2(%arg0: i32) -> (i32, i32) {
    %c0_i32 = arith.constant 0 : i32
    %c0_i32_0 = arith.constant 0 : i32
    %c0_i32_1 = arith.constant 0 : i32
    return %c0_i32, %c0_i32_0 : i32, i32
  }
  func.func @transform_3(%arg0: i32) -> (i32, i32) {
    %c0_i32 = arith.constant 0 : i32
    %c0_i32_0 = arith.constant 0 : i32
    %c0_i32_1 = arith.constant 0 : i32
    return %c0_i32, %c0_i32_0 : i32, i32
  }
  func.func @transform_4(%arg0: i32) -> (i32, i32) {
    %c0_i32 = arith.constant 0 : i32
    %c0_i32_0 = arith.constant 0 : i32
    %c0_i32_1 = arith.constant 0 : i32
    return %c0_i32, %c0_i32_0 : i32, i32
  }
  func.func @transform_5(%arg0: i32) -> (i32, i32) {
    %c0_i32 = arith.constant 0 : i32
    %c0_i32_0 = arith.constant 0 : i32
    %c0_i32_1 = arith.constant 0 : i32
    return %c0_i32, %c0_i32_0 : i32, i32
  }
  func.func @transform_6(%arg0: i32) -> (i32, i32) {
    %c0_i32 = arith.constant 0 : i32
    %c0_i32_0 = arith.constant 0 : i32
    %c0_i32_1 = arith.constant 0 : i32
    return %c0_i32, %c0_i32_0 : i32, i32
  }
  func.func @transform_7(%arg0: i32) -> (i32, i32) {
    %c0_i32 = arith.constant 0 : i32
    %c0_i32_0 = arith.constant 0 : i32
    return %arg0, %c0_i32 : i32, i32
  }
}

</mosaic_0001>

<bundles_post_ra>
// kernel: dqn_forward.1
= control target key start
LH: loop header
LB: loop body
LE: loop exit
PB: predicated region body
PF: predicated region fallthrough
CT: control target
= control target key end

     0   :  { %12 = vsyncpa [#allocation3], 0  ;;  %s914_s0 = inlined_call_operand.vmem [shape: f32[8,4], index: 0, kind: input, shape index: {}]   ;;  %s915_s1 = inlined_call_operand.vmem [shape: f32[4,256], index: 1, kind: input, shape index: {}]   ;;  %s916_s2 = inlined_call_operand.vmem [shape: f32[1,256], index: 2, kind: input, shape index: {}]   ;;  %s917_s3 = inlined_call_operand.hbm [shape: bf16[256,256], index: 3, kind: input, shape index: {}]   ;;  %s918_s4 = inlined_call_operand.vmem [shape: f32[1,256], index: 4, kind: input, shape index: {}]   ;;  %s919_s5 = inlined_call_operand.hbm [shape: bf16[256,128], index: 5, kind: input, shape index: {}]   ;;  %s920_s6 = inlined_call_operand.vmem [shape: f32[1,128], index: 6, kind: input, shape index: {}]   ;;  %s921_s7 = inlined_call_operand.vmem [shape: f32[8,128], index: 7, kind: output, shape index: {}]  }
   0x1   :  { %13 = vsyncpa [#allocation5], 0  ;;  %s808_s24 = smov [#allocation2]   ;;  %s760_s28 = scalar_lea.hbm %s917_s3, 4096 }
   0x2   :  { %s25_s25 = sshll.u32 %s808_s24, 4  ;;  %p761_p0 = scmp.ne.s32.totalorder %s917_s3, %s760_s28  ;;  %s26_s25 = int_to_ptr.vmem [resolvable:$true] %s25_s25 }
   0x3   :  { %p764_p1 = scmp.lt.u32.totalorder %s760_s28, %s917_s3 }
   0x5   :  { %p766_p2 = pnand %p764_p1, %p761_p0 }
   0x7   :  { %769 = shalt.err (!%p766_p2)
}
   0x8   :  { %s770_s10 = scalar_lea.vmem %s26_s25, 4096  ;;  %p775_p4 = scmp.lt.s32.totalorder %s26_s25, %s26_s25 }
   0x9   :  { %p771_p3 = scmp.ne.s32.totalorder %s26_s25, %s770_s10  ;;  %p776_p5 = scmp.lt.s32.totalorder %s770_s10, %s770_s10 }
   0xb   :  { %p777_p6 = por %p776_p5, %p775_p4 }
   0xd   :  { %p778_p7 = pnand %p777_p6, %p771_p3 }
   0xf   :  { %781 = shalt.err (!%p778_p7)
}
  0x10   :  { %s809_s11 = smov 128   ;;  %s810_s12 = smov 8  }
  0x11   :  { %31 = dma.hbm_to_vmem [thread:$0]  %s917_s3, 4096, %s26_s25, [#allocation3], %s809_s11, %s809_s11, %s810_s12  }
  0x12   :  { %s811_s15 = smov [#allocation4]   ;;  %s782_s19 = scalar_lea.hbm %s919_s5, 2048 }
  0x13   :  { %s39_s16 = sshll.u32 %s811_s15, 4  ;;  %p783_p8 = scmp.ne.s32.totalorder %s919_s5, %s782_s19  ;;  %s40_s16 = int_to_ptr.vmem [resolvable:$true] %s39_s16 }
  0x14   :  { %p786_p9 = scmp.lt.u32.totalorder %s782_s19, %s919_s5 }
  0x16   :  { %p788_p10 = pnand %p786_p9, %p783_p8 }
  0x18   :  { %791 = shalt.err (!%p788_p10)
}
  0x19   :  { %s792_s24 = scalar_lea.vmem %s40_s16, 2048  ;;  %p797_p12 = scmp.lt.s32.totalorder %s40_s16, %s40_s16 }
  0x1a   :  { %p793_p11 = scmp.ne.s32.totalorder %s40_s16, %s792_s24  ;;  %p798_p13 = scmp.lt.s32.totalorder %s792_s24, %s792_s24 }
  0x1c   :  { %p799_p0 = por %p798_p13, %p797_p12 }
  0x1e   :  { %p800_p1 = pnand %p799_p0, %p793_p11 }
  0x20   :  { %803 = shalt.err (!%p800_p1)
}
  0x21   :  { %s812_s3 = smov 64   ;;  %s813_s25 = smov 4  }
  0x22   :  { %45 = dma.hbm_to_vmem [thread:$0]  %s919_s5, 2048, %s40_s16, [#allocation5], %s812_s3, %s812_s3, %s813_s25  }
  0x23   :  { %804 = dma.done.wait [#allocation3], 4096  }
  0x24   :  { %805 = vsyncadd [#allocation3], 4294963200 }
  0x25   :  { %806 = dma.done.wait [#allocation5], 2048  }
  0x26   :  { %807 = vsyncadd [#allocation5], 4294965248  ;;  %v814_v0 = vmov 0   ;;  %v815_v1 = vmov 2   ;;  %v55_v2 = vld [vmem:[%s914_s0] sm:$0xff]  ;;  %v816_v7 = vmov 1   ;;  %v64_v49 = vlaneseq }
  0x27   :  { %691 = vset.pattern.permute.xlu0 %v814_v0  ;;  %693 = vset.pattern.permute.xlu1 %v815_v1  ;;  %v696_v3 = vld [vmem:[#allocation2 + $0x4] ss:$8 sps:$4 sm:$0xff]   ;;  %v698_v4 = vld [vmem:[#allocation2] ss:$8 sps:$4 sm:$0xff]   ;;  %v699_v5 = vld [vmem:[#allocation2 + $0x14] ss:$8 sps:$4 sm:$0xff]  }
  0x28   :  { %60 = vperm.xlu0 %691, %v55_v2   ;;  %124 = vperm.xlu1 %693, %v55_v2   ;;  %v701_v6 = vld [vmem:[#allocation2 + $0x10] ss:$8 sps:$4 sm:$0xff]   ;;  %v817_v8 = vmov 3   ;;  %v702_v9 = vld [vmem:[#allocation2 + $0x24] ss:$8 sps:$4 sm:$0xff]   ;;  %v65_v50 = vshrl.u32 %v64_v49, 7 }
  0x29   :  { %383 = vmatprep.subr.bf16.mxu0 %v696_v3  ;;  %v704_v10 = vld [vmem:[#allocation2 + $0x20] ss:$8 sps:$4 sm:$0xff]   ;;  %v705_v11 = vld [vmem:[#allocation2 + $0x34] ss:$8 sps:$4 sm:$0xff]   ;;  %v707_v12 = vld [vmem:[#allocation2 + $0x30] ss:$8 sps:$4 sm:$0xff]  }
  0x2a   :  { %384 = vmatpush1.bf16.msra.mxu0 %v698_v4  ;;  %v708_v13 = vld [vmem:[#allocation2 + $0x44] ss:$8 sps:$4 sm:$0xff]   ;;  %v710_v14 = vld [vmem:[#allocation2 + $0x40] ss:$8 sps:$4 sm:$0xff]   ;;  %v711_v15 = vld [vmem:[#allocation2 + $0x54] ss:$8 sps:$4 sm:$0xff]  }
  0x2b   :  { %385 = vmatprep.subr.bf16.mxu0 %v699_v5  ;;  %v713_v16 = vld [vmem:[#allocation2 + $0x50] ss:$8 sps:$4 sm:$0xff]   ;;  %v714_v17 = vld [vmem:[#allocation2 + $0x64] ss:$8 sps:$4 sm:$0xff]   ;;  %v716_v18 = vld [vmem:[#allocation2 + $0x60] ss:$8 sps:$4 sm:$0xff]  }
  0x2c   :  { %692 = vset.pattern.permute.xlu0 %v816_v7  ;;  %694 = vset.pattern.permute.xlu1 %v817_v8  ;;  %v717_v19 = vld [vmem:[#allocation2 + $0x74] ss:$8 sps:$4 sm:$0xff]   ;;  %v744_v20 = vld [vmem:[#allocation4 + $0x40] sm:$0xff]   ;;  %v746_v22 = vld [vmem:[#allocation4 + $0x48] sm:$0xff]   ;;  %v885_v51 = vsub.s32 0, %v65_v50  ;;  %v70_v52 = vsub.s32 4, %v65_v50 }
  0x2d   :  { %98 = vperm.xlu0 %692, %v55_v2   ;;  %150 = vperm.xlu1 %694, %v55_v2   ;;  %v745_v21 = vld [vmem:[#allocation4] sm:$0xff]   ;;  %v747_v23 = vld [vmem:[#allocation4 + $0x8] sm:$0xff]   ;;  %v748_v24 = vld [vmem:[#allocation4 + $0x50] sm:$0xff]   ;;  %v891_v56 = vsub.s32 1, %v65_v50  ;;  %v107_v57 = vsub.s32 5, %v65_v50  ;;  %v129_v58 = vsub.s32 2, %v65_v50 }
  0x2e   :  { %386 = vmatpush1.bf16.msra.mxu0 %v701_v6  ;;  %659 = vmatprep.subr.bf16.mxu1 %v744_v20  ;;  %v719_v25 = vld [vmem:[#allocation2 + $0x70] ss:$8 sps:$4 sm:$0xff]   ;;  %v720_v26 = vld [vmem:[#allocation2 + $0x84] ss:$8 sps:$4 sm:$0xff]   ;;  %v722_v29 = vld [vmem:[#allocation2 + $0x80] ss:$8 sps:$4 sm:$0xff]  }
  0x2f   :  { %387 = vmatprep.subr.bf16.mxu0 %v702_v9  ;;  %660 = vmatpush3.bf16.msra.mxu1 %v745_v21  ;;  %v749_v27 = vld [vmem:[#allocation4 + $0x10] sm:$0xff]   ;;  %v750_v28 = vld [vmem:[#allocation4 + $0x58] sm:$0xff]   ;;  %v752_v33 = vld [vmem:[#allocation4 + $0x60] sm:$0xff]   ;;  %v133_v59 = vsub.s32 6, %v65_v50  ;;  %v155_v60 = vsub.s32 3, %v65_v50  ;;  %v159_v61 = vsub.s32 7, %v65_v50 }
  0x30   :  { %661 = vmatprep.subr.bf16.mxu1 %v746_v22  ;;  %v723_v30 = vld [vmem:[#allocation2 + $0x94] ss:$8 sps:$4 sm:$0xff]   ;;  %v725_v31 = vld [vmem:[#allocation2 + $0x90] ss:$8 sps:$4 sm:$0xff]   ;;  %v726_v34 = vld [vmem:[#allocation2 + $0xa4] ss:$8 sps:$4 sm:$0xff]  }
  0x31   :  { %695 = vset.pattern.permute.xlu0 %v817_v8  ;;  %v751_v32 = vld [vmem:[#allocation4 + $0x18] sm:$0xff]   ;;  %v753_v35 = vld [vmem:[#allocation4 + $0x20] sm:$0xff]   ;;  %v754_v36 = vld [vmem:[#allocation4 + $0x68] sm:$0xff]  }
  0x32   :  { %388 = vmatpush1.bf16.msra.mxu0 %v704_v10  ;;  %v728_v37 = vld [vmem:[#allocation2 + $0xa0] ss:$8 sps:$4 sm:$0xff]   ;;  %v729_v38 = vld [vmem:[#allocation2 + $0xb4] ss:$8 sps:$4 sm:$0xff]   ;;  %v731_v40 = vld [vmem:[#allocation2 + $0xb0] ss:$8 sps:$4 sm:$0xff]  }
  0x33   :  { %389 = vmatprep.subr.bf16.mxu0 %v705_v11  ;;  %662 = vmatpush3.bf16.msra.mxu1 %v747_v23  ;;  %v755_v39 = vld [vmem:[#allocation4 + $0x28] sm:$0xff]   ;;  %v735_v43 = vld [vmem:[#allocation2 + $0xd4] ss:$8 sps:$4 sm:$0xff]   ;;  %v737_v44 = vld [vmem:[#allocation2 + $0xd0] ss:$8 sps:$4 sm:$0xff]  }
  0x34   :  { %663 = vmatprep.subr.bf16.mxu1 %v748_v24  ;;  %v732_v41 = vld [vmem:[#allocation2 + $0xc4] ss:$8 sps:$4 sm:$0xff]   ;;  %v734_v42 = vld [vmem:[#allocation2 + $0xc0] ss:$8 sps:$4 sm:$0xff]   ;;  %v741_v47 = vld [vmem:[#allocation2 + $0xf4] ss:$8 sps:$4 sm:$0xff]  }
  0x35   :  { %v738_v45 = vld [vmem:[#allocation2 + $0xe4] ss:$8 sps:$4 sm:$0xff]   ;;  %v740_v46 = vld [vmem:[#allocation2 + $0xe0] ss:$8 sps:$4 sm:$0xff]   ;;  %v743_v48 = vld [vmem:[#allocation2 + $0xf0] ss:$8 sps:$4 sm:$0xff]  }
  0x36   :  { %390 = vmatpush1.bf16.msra.mxu0 %v707_v12  ;;  %v56_v53 = vld [vmem:[%s915_s1] sm:$0xff] }
  0x37   :  { %391 = vmatprep.subr.bf16.mxu0 %v708_v13  ;;  %664 = vmatpush3.bf16.msra.mxu1 %v749_v27  ;;  %v67_v54 = vrot.slane %v56_v53, %v885_v51  ;;  %v71_v55 = vrot.slane %v56_v53, %v70_v52  ;;  %v57_v62 = vld [vmem:[%s916_s2] sm:$0x3]  ;;  %v104_v1 = vrot.slane %v56_v53, %v891_v56 }
  0x38   :  { %665 = vmatprep.subr.bf16.mxu1 %v750_v28  ;;  %v108_v2 = vrot.slane %v56_v53, %v107_v57  ;;  %v130_v3 = vrot.slane %v56_v53, %v129_v58  ;;  %v134_v4 = vrot.slane %v56_v53, %v133_v59  ;;  %v156_v7 = vrot.slane %v56_v53, %v155_v60  ;;  %v642_v59 = vld [vmem:[%s920_s6] ss:$0 sm:$0xff] }
  0x39   :  { %v77_v63 = vrot.slane %v67_v54, %v885_v51  ;;  %v81_v0 = vrot.slane %v71_v55, %v885_v51  ;;  %v160_v8 = vrot.slane %v56_v53, %v159_v61  ;;  %v88_v9 = vrot.slane %v57_v62, %v885_v51 }
  0x3a   :  { %392 = vmatpush1.bf16.msra.mxu0 %v710_v14  ;;  %v92_v10 = vrot.slane %v57_v62, %v891_v56  ;;  %v114_v13 = vrot.slane %v104_v1, %v891_v56  ;;  %v118_v14 = vrot.slane %v108_v2, %v891_v56 }
  0x3b   :  { %393 = vmatprep.subr.bf16.mxu0 %v711_v15  ;;  %666 = vmatpush3.bf16.msra.mxu1 %v751_v32  ;;  %v140_v15 = vrot.slane %v130_v3, %v129_v58 }
  0x3c   :  { %667 = vmatprep.subr.bf16.mxu1 %v752_v33 }
  0x3e   :  { %394 = vmatpush1.bf16.msra.mxu0 %v713_v16  ;;  %v144_v16 = vrot.slane %v134_v4, %v129_v58 }
  0x3f   :  { %395 = vmatprep.subr.bf16.mxu0 %v714_v17  ;;  %668 = vmatpush3.bf16.msra.mxu1 %v753_v35  ;;  %v166_v17 = vrot.slane %v156_v7, %v155_v60 }
  0x40   :  { %669 = vmatprep.subr.bf16.mxu1 %v754_v36 }
  0x42   :  { %396 = vmatpush1.bf16.msra.mxu0 %v716_v18  ;;  %v170_v18 = vrot.slane %v160_v8, %v155_v60 }
  0x43   :  { %397 = vmatprep.subr.bf16.mxu0 %v717_v19  ;;  %670 = vmatpush3.bf16.msra.mxu1 %v755_v39  ;;  %v756_v39 = vld [vmem:[#allocation4 + $0x70] sm:$0xff]  }
  0x44   :  { %671 = vmatprep.subr.bf16.mxu1 %v756_v39 }
  0x46   :  { %398 = vmatpush1.bf16.msra.mxu0 %v719_v25 }
  0x47   :  { %399 = vmatprep.subr.bf16.mxu0 %v720_v26 }
  0x4a   :  { %400 = vmatpush1.bf16.msra.mxu0 %v722_v29 }
  0x4b   :  { %401 = vmatprep.subr.bf16.mxu0 %v723_v30 }
  0x4e   :  { %402 = vmatpush1.bf16.msra.mxu0 %v725_v31 }
  0x4f   :  { %403 = vmatprep.subr.bf16.mxu0 %v726_v34 }
  0x52   :  { %404 = vmatpush1.bf16.msra.mxu0 %v728_v37 }
  0x53   :  { %405 = vmatprep.subr.bf16.mxu0 %v729_v38 }
  0x56   :  { %406 = vmatpush1.bf16.msra.mxu0 %v731_v40  ;;  %v757_v40 = vld [vmem:[#allocation4 + $0x30] sm:$0xff]  }
  0x57   :  { %407 = vmatprep.subr.bf16.mxu0 %v732_v41  ;;  %672 = vmatpush3.bf16.msra.mxu1 %v757_v40  ;;  %v758_v41 = vld [vmem:[#allocation4 + $0x78] sm:$0xff]  }
  0x58   :  { %673 = vmatprep.subr.bf16.mxu1 %v758_v41 }
  0x5a   :  { %408 = vmatpush1.bf16.msra.mxu0 %v734_v42  ;;  %v759_v42 = vld [vmem:[#allocation4 + $0x38] sm:$0xff]  }
  0x5b   :  { %409 = vmatprep.subr.bf16.mxu0 %v735_v43  ;;  %674 = vmatpush3.bf16.msra.mxu1 %v759_v42  ;;  %v211_v43 = vld [vmem:[%s918_s4] sm:$0x3] }
  0x5e   :  { %410 = vmatpush1.bf16.msra.mxu0 %v737_v44  ;;  %v216_v44 = vrot.slane %v211_v43, %v885_v51 }
  0x5f   :  { %411 = vmatprep.subr.bf16.mxu0 %v738_v45  ;;  %v220_v45 = vrot.slane %v211_v43, %v891_v56 }
  0x62   :  { %412 = vmatpush1.bf16.msra.mxu0 %v740_v46 }
  0x63   :  { %413 = vmatprep.subr.bf16.mxu0 %v741_v47 }
  0x66   :  { %414 = vmatpush1.bf16.msra.mxu0 %v743_v48 }
  0xa7   :  { %v61_v5 = vpop.permute.xlu0 %60  ;;  %v125_v6 = vpop.permute.xlu1 %124 }
  0xa8   :  { %v82_v11 = vmul.f32 %v77_v63, %v61_v5  ;;  %v83_v12 = vmul.f32 %v81_v0, %v61_v5  ;;  %v145_v25 = vmul.f32 %v140_v15, %v125_v6  ;;  %v146_v26 = vmul.f32 %v144_v16, %v125_v6 }
  0xaa   :  { %v95_v21 = vadd.f32 %v88_v9, %v82_v11  ;;  %v96_v22 = vadd.f32 %v92_v10, %v83_v12 }
  0xac   :  { %v99_v19 = vpop.permute.xlu0 %98  ;;  %v151_v20 = vpop.permute.xlu1 %150 }
  0xad   :  { %v119_v23 = vmul.f32 %v114_v13, %v99_v19  ;;  %v120_v24 = vmul.f32 %v118_v14, %v99_v19  ;;  %v171_v29 = vmul.f32 %v166_v17, %v151_v20  ;;  %v172_v30 = vmul.f32 %v170_v18, %v151_v20 }
  0xaf   :  { %v121_v27 = vadd.f32 %v119_v23, %v95_v21  ;;  %v122_v28 = vadd.f32 %v120_v24, %v96_v22 }
  0xb1   :  { %v147_v31 = vadd.f32 %v145_v25, %v121_v27  ;;  %v148_v32 = vadd.f32 %v146_v26, %v122_v28 }
  0xb3   :  { %v173_v33 = vadd.f32 %v171_v29, %v147_v31  ;;  %v174_v34 = vadd.f32 %v172_v30, %v148_v32 }
  0xb5   :  { %v175_v35 = vmax.f32 %v173_v33, 0.0  ;;  %v176_v36 = vmax.f32 %v174_v34, 0.0 }
  0xb7   :  { %v177_v37 = vpack.c.bf16 %v175_v35, %v175_v35  ;;  %v178_v38 = vpack.c.bf16 %v176_v36, %v176_v36 }
  0xb9   :  { %415 = vmatprep.mubr.bf16.mxu0 %v178_v38 }
  0xba   :  { %416 = vmatmul.mubr.bf16.vlgmr.msra.gmra.mrb[0].mxu0 %v177_v37 }
 0x18d   :  { %v417_v46 = vpop.f32.mrb[0].mxu0 }
 0x18e   :  { %v418_v47 = vadd.f32 %v417_v46, %v216_v44  ;;  %v419_v48 = vpop.f32.mrb[1].mxu0 }
 0x18f   :  { %v420_v49 = vadd.f32 %v419_v48, %v220_v45  ;;  %v421_v50 = vpop.f32.mrb[2].mxu0 }
 0x190   :  { %v424_v52 = vmax.f32 %v418_v47, 0.0  ;;  %v422_v53 = vpop.f32.mrb[3].mxu0 }
 0x191   :  { %v425_v54 = vmax.f32 %v420_v49, 0.0 }
 0x192   :  { %v426_v57 = vpack.c.bf16 %v424_v52, %v424_v52 }
 0x193   :  { %v427_v55 = vpack.c.bf16 %v425_v54, %v425_v54 }
 0x195   :  { %595 = vmatprep.mubr.bf16.mxu1 %v427_v55 }
 0x196   :  { %596 = vmatmul.mubr.bf16.vlgmr.msra.gmra.mrb[0].mxu1 %v426_v57 }
 0x269   :  { %v675_v58 = vpop.f32.mrb[0].mxu1 }
 0x26a   :  { %v676_v51 = vpop.f32.mrb[1].mxu1 }
 0x26b   :  { %v677_v60 = vadd.f32 %v676_v51, %v675_v58  ;;  %v678_v56 = vpop.f32.mrb[2].mxu1 }
 0x26c   :  { %v679_v61 = vpop.f32.mrb[3].mxu1 }
 0x26d   :  { %v598_v62 = vadd.f32 %v677_v60, %v642_v59 }
 0x26f   :  { %603 = vst [vmem:[%s921_s7] sm:$0xff] %v598_v62 }
 0x270   :  { %608 = vsyncpa [#allocation3], 1 }
 0x271   :  { %609 = vsyncpa [#allocation5], 1 }

</bundles_post_ra>
